<compile_context>
chip_gen: v6e
topology: v6e:2x2x1
jax: 0.10.0
libtpu: 0.0.40
codegen_flags: <defaults>
</compile_context>

<pallas_src>
import functools

import jax
import jax.numpy as jnp
import numpy as np
from jax.experimental import pallas as pl
from jax.experimental.pallas import tpu as pltpu


def _lif_kernel(x_ref, o_ref, mem_ref, spk_ref, *, thresh, decay):
    # x_ref/o_ref: (1, row_tile, 128) VMEM tiles for the current (tile, step).
    # mem_ref/spk_ref: (row_tile, 128) VMEM scratch carried across the step axis.
    s = pl.program_id(1)

    @pl.when(s == 0)
    def _():
        mem_ref[...] = jnp.zeros_like(mem_ref)
        spk_ref[...] = jnp.zeros_like(spk_ref)

    x = x_ref[0]  # (row_tile, 128)
    mem = mem_ref[...] * jnp.float32(decay) * (1.0 - spk_ref[...]) + x
    spk = (mem > jnp.float32(thresh)).astype(x.dtype)
    mem_ref[...] = mem
    spk_ref[...] = spk
    o_ref[0] = spk


def lif_spike(x, thresh=0.5, decay=0.2):
    """Pallas TPU implementation of LIF_Spike.forward (x: (step, ...) float32)."""
    step = x.shape[0]
    orig_shape = x.shape
    per = int(np.prod(orig_shape[1:]))

    lane = 128
    rows = pl.cdiv(per, lane)
    rows_p = ((rows + 7) // 8) * 8            # sublane multiple of 8

    # Fixed-size row tiles: 512x128 f32 = 256 KiB/block -> ~1.5 MiB resident
    # with double buffering + 2 scratch planes; safe on v5e/v6e/v7x VMEM.
    if rows_p <= 512:
        row_tile = rows_p
    else:
        row_tile = 512
        rows_p = ((rows_p + row_tile - 1) // row_tile) * row_tile

    padded = rows_p * lane
    xf = x.reshape(step, per)
    if padded != per:
        # Only pad when the flattened per-step size is not already lane/sublane
        # aligned (common CNN shapes hit the no-pad fast path).
        xf = jnp.pad(xf, ((0, 0), (0, padded - per)))
    xf = xf.reshape(step, rows_p, lane)

    num_tiles = rows_p // row_tile

    out = pl.pallas_call(
        functools.partial(_lif_kernel, thresh=float(thresh), decay=float(decay)),
        out_shape=jax.ShapeDtypeStruct(xf.shape, xf.dtype),
        grid_spec=pltpu.PrefetchScalarGridSpec(
            num_scalar_prefetch=0,
            grid=(num_tiles, step),                      # step last: sequential carry
            in_specs=[pl.BlockSpec((1, row_tile, lane), lambda r, s: (s, r, 0))],
            out_specs=pl.BlockSpec((1, row_tile, lane), lambda r, s: (s, r, 0)),
            scratch_shapes=[pltpu.VMEM((row_tile, lane), jnp.float32),   # mem
                            pltpu.VMEM((row_tile, lane), jnp.float32)],  # spk
        ),
        compiler_params=pltpu.CompilerParams(
            dimension_semantics=("parallel", "arbitrary"),
            vmem_limit_bytes=32 * 1024 * 1024,
        ),
    )(xf)

    if padded != per:
        out = out.reshape(step, padded)[:, :per]
    return out.reshape(orig_shape)


def _lif_ref(x, thresh=0.5, decay=0.2):
    """Pure-JAX reference of the same forward."""
    def body(carry, xt):
        mem, spk = carry
        mem = mem * decay * (1.0 - spk) + xt
        spk = (mem > thresh).astype(xt.dtype)
        return (mem, spk), spk

    zeros = jnp.zeros(x.shape[1:], x.dtype)
    _, out = jax.lax.scan(body, (zeros, zeros), x)
    return out


if __name__ == "__main__":
    key = jax.random.PRNGKey(0)
    # step=2, channels=4, spatial=16x16 (matches the module's per-step layout)
    x = jax.random.normal(key, (2, 4, 16, 16), dtype=jnp.float32)

    y = lif_spike(x, thresh=0.5, decay=0.2)
    y = jax.block_until_ready(y)

    y_ref = _lif_ref(x, thresh=0.5, decay=0.2)

    # spikes are exactly 0/1 and match the sequential reference
    assert y.shape == x.shape
    assert bool(jnp.all(jnp.logical_or(y == 0.0, y == 1.0))), "non-binary spikes"
    assert bool(jnp.allclose(y, y_ref)), "mismatch vs sequential LIF reference"

    # sanity: some but not all neurons spike for standard-normal input
    frac = float(jnp.mean(y))
    assert 0.05 < frac < 0.95, f"implausible spike fraction {frac}"

    print("KERNEL_OK")
</pallas_src>

<mosaic_0001>
module attributes {stable_mosaic.version = 11 : i64} {
  func.func @_lif_kernel(%arg0: i32, %arg1: i32, %arg2: memref<1x8x128xf32, #tpu.memory_space<vmem>>, %arg3: memref<1x8x128xf32, #tpu.memory_space<vmem>>, %arg4: memref<8x128xf32, #tpu.memory_space<vmem>>, %arg5: memref<8x128xf32, #tpu.memory_space<vmem>>) attributes {dimension_semantics = [#tpu.dimension_semantics<parallel>, #tpu.dimension_semantics<arbitrary>], iteration_bounds = array<i64: 1, 2>, scalar_prefetch = 0 : i64, scratch_operands = 2 : i64, tpu.core_type = #tpu.core_type<tc>, window_params = [{transform_indices = @transform_0, window_bounds = array<i64: 1, 8, 128>}, {transform_indices = @transform_1, window_bounds = array<i64: 1, 8, 128>}]} {
    %c0_i32 = arith.constant 0 : i32
    %0 = arith.cmpi eq, %arg1, %c0_i32 : i32
    %1 = arith.extui %0 : i1 to i32
    %c0_i32_0 = arith.constant 0 : i32
    %2 = arith.cmpi ne, %1, %c0_i32_0 : i32
    scf.if %2 {
      %cst_16 = arith.constant 0.000000e+00 : f32
      %22 = vector.broadcast %cst_16 : f32 to vector<8x128xf32>
      %c0_17 = arith.constant 0 : index
      %c0_18 = arith.constant 0 : index
      %23 = vector.load %arg4[%c0_17, %c0_18] : memref<8x128xf32, #tpu.memory_space<vmem>>, vector<8x128xf32>
      tpu.vector_store %arg4[%c0_17, %c0_18], %22 {strides = array<i32>} : memref<8x128xf32, #tpu.memory_space<vmem>>, vector<8x128xf32>,
      %cst_19 = arith.constant 0.000000e+00 : f32
      %24 = vector.broadcast %cst_19 : f32 to vector<8x128xf32>
      %c0_20 = arith.constant 0 : index
      %c0_21 = arith.constant 0 : index
      %25 = vector.load %arg5[%c0_20, %c0_21] : memref<8x128xf32, #tpu.memory_space<vmem>>, vector<8x128xf32>
      tpu.vector_store %arg5[%c0_20, %c0_21], %24 {strides = array<i32>} : memref<8x128xf32, #tpu.memory_space<vmem>>, vector<8x128xf32>,
    } else {
    }
    %c0 = arith.constant 0 : index
    %c0_1 = arith.constant 0 : index
    %c0_2 = arith.constant 0 : index
    %3 = vector.load %arg2[%c0, %c0_1, %c0_2] : memref<1x8x128xf32, #tpu.memory_space<vmem>>, vector<1x8x128xf32>
    %4 = vector.shape_cast %3 : vector<1x8x128xf32> to vector<8x128xf32>
    %c0_3 = arith.constant 0 : index
    %c0_4 = arith.constant 0 : index
    %5 = vector.load %arg4[%c0_3, %c0_4] : memref<8x128xf32, #tpu.memory_space<vmem>>, vector<8x128xf32>
    %cst = arith.constant 2.000000e-01 : f32
    %6 = vector.broadcast %cst : f32 to vector<8x128xf32>
    %7 = arith.mulf %5, %6 : vector<8x128xf32>
    %c0_5 = arith.constant 0 : index
    %c0_6 = arith.constant 0 : index
    %8 = vector.load %arg5[%c0_5, %c0_6] : memref<8x128xf32, #tpu.memory_space<vmem>>, vector<8x128xf32>
    %cst_7 = arith.constant 1.000000e+00 : f32
    %9 = vector.broadcast %cst_7 : f32 to vector<8x128xf32>
    %10 = arith.subf %9, %8 : vector<8x128xf32>
    %11 = arith.mulf %7, %10 : vector<8x128xf32>
    %12 = arith.addf %11, %4 : vector<8x128xf32>
    %cst_8 = arith.constant 5.000000e-01 : f32
    %13 = vector.broadcast %cst_8 : f32 to vector<8x128xf32>
    %14 = arith.cmpf ogt, %12, %13 : vector<8x128xf32>
    %15 = arith.extui %14 : vector<8x128xi1> to vector<8x128xi32>
    %16 = arith.sitofp %15 : vector<8x128xi32> to vector<8x128xf32>
    %c0_9 = arith.constant 0 : index
    %c0_10 = arith.constant 0 : index
    %17 = vector.load %arg4[%c0_9, %c0_10] : memref<8x128xf32, #tpu.memory_space<vmem>>, vector<8x128xf32>
    tpu.vector_store %arg4[%c0_9, %c0_10], %12 {strides = array<i32>} : memref<8x128xf32, #tpu.memory_space<vmem>>, vector<8x128xf32>,
    %c0_11 = arith.constant 0 : index
    %c0_12 = arith.constant 0 : index
    %18 = vector.load %arg5[%c0_11, %c0_12] : memref<8x128xf32, #tpu.memory_space<vmem>>, vector<8x128xf32>
    tpu.vector_store %arg5[%c0_11, %c0_12], %16 {strides = array<i32>} : memref<8x128xf32, #tpu.memory_space<vmem>>, vector<8x128xf32>,
    %c0_13 = arith.constant 0 : index
    %c0_14 = arith.constant 0 : index
    %c0_15 = arith.constant 0 : index
    %19 = vector.load %arg3[%c0_13, %c0_14, %c0_15] : memref<1x8x128xf32, #tpu.memory_space<vmem>>, vector<1x8x128xf32>
    %20 = vector.shape_cast %19 : vector<1x8x128xf32> to vector<8x128xf32>
    %21 = vector.shape_cast %16 : vector<8x128xf32> to vector<1x8x128xf32>
    tpu.vector_store %arg3[%c0_13, %c0_14, %c0_15], %21 {strides = array<i32>} : memref<1x8x128xf32, #tpu.memory_space<vmem>>, vector<1x8x128xf32>,
    return
  }
  func.func @transform_0(%arg0: i32, %arg1: i32) -> (i32, i32, i32) {
    %c0_i32 = arith.constant 0 : i32
    %c0_i32_0 = arith.constant 0 : i32
    return %arg1, %arg0, %c0_i32 : i32, i32, i32
  }
  func.func @transform_1(%arg0: i32, %arg1: i32) -> (i32, i32, i32) {
    %c0_i32 = arith.constant 0 : i32
    %c0_i32_0 = arith.constant 0 : i32
    return %arg1, %arg0, %c0_i32 : i32, i32, i32
  }
}

</mosaic_0001>

<bundles_post_ra>
// kernel: tpu_custom_call.1
= control target key start
LH: loop header
LB: loop body
LE: loop exit
PB: predicated region body
PF: predicated region fallthrough
CT: control target
= control target key end

     0   :  { %6 = vsyncpa [#allocation5], 0  ;;  %s613_s0 = inlined_call_operand.hbm [shape: f32[2,8,128], index: 0, kind: input, shape index: {}]   ;;  %s614_s1 = inlined_call_operand.hbm [shape: f32[2,8,128], index: 1, kind: output, shape index: {}]  }
   0x1   :  { %8 = vsyncpa [#allocation5 + $0x1], 0 }
   0x2   :  { %9 = vsyncpa [#allocation6], 0 }
   0x3   :  { %11 = vsyncpa [#allocation6 + $0x1], 0  ;;  %s466_s6 = smov 0   ;;  %s468_s7 = smov 0  }
   0x4   :  { %s470_s8 = smov 0   ;;  %s472_s9 = smov 0  }
   0x5   :  { %s474_s10 = smov 0   ;;  %s476_s11 = smov 0  }
   0x6 LB: > { %s263_s12 = sadd.s32 4294967295, %s450_s11   ;;  %s264_s13 = sadd.s32 4294967294, %s450_s11   ;;  %s450_s11 = sphi %s476_s11, %s17_s11   ;;  %s446_s10 = sphi %s474_s10, %s626_s10   ;;  %s442_s9 = sphi %s472_s9, %s625_s9   ;;  %s438_s8 = sphi %s470_s8, %s624_s8   ;;  %s434_s7 = sphi %s468_s7, %s623_s7   ;;  %s430_s6 = sphi %s466_s6, %s622_s6  }
   0x7   : > { %s26_s14 = sadd.s32 1, %s446_s10  ;;  %s38_s15 = sadd.s32 1, %s438_s8 }
   0x8   : > { %p27_p0 = scmp.ge.s32.totalorder %s26_s14, 2  ;;  %p45_p1 = scmp.ne.s32.totalorder %s438_s8, %s434_s7 }
   0x9   : > { %p46_p2 = scmp.eq.s32.totalorder %s450_s11, 0  ;;  %p51_p3 = scmp.ne.s32.totalorder %s434_s7, %s430_s6 }
   0xa   : > { %s628_s14 = smov (%p27_p0, %s26_s14), 0  ;;  %p52_p5 = scmp.eq.s32.totalorder %s263_s12, 0 }
   0xb   : > { %p507_p4 = por %p46_p2, %p45_p1  ;;  %s33_s17 = ssub.s32 %s446_s10, %s628_s14 }
   0xc   : > { %p77_p6 = scmp.eq.s32.totalorder %s263_s12, 1  ;;  %p36_p7 = scmp.eq.s32.totalorder %s33_s17, 0 }
   0xd   : > { %p513_p8 = por %p52_p5, %p51_p3  ;;  %p83_p10 = scmp.eq.s32.totalorder %s264_s13, 1 }
   0xe   : > { %p517_p9 = por %p77_p6, %p45_p1  ;;  %p290_p13 = scmp.lt.s32.totalorder %s450_s11, 2 }
   0xf   : > { %s522_s20 = scalar_select %p36_p7, %s438_s8, %s38_s15  }
  0x10   : > { %p524_p11 = por %p83_p10, %p51_p3  ;;  %s103_s22 = sand.u32 1, %s438_s8  }
  0x11   : > { %s267_s23 = sshll.u32 %s103_s22, 3  ;;  %s268_s24 = sshll.u32 %s446_s10, 7 }
  0x12   : > { %s618_s21 = scalar_select %p524_p11, 1, 0 }
  0x13   : > { %s113_s27 = scalar_lea.hbm %s613_s0, %s268_s24  ;;  %s107_s28 = scalar_lea.vmem [#allocation4], %s267_s23 }
  0x14   : > { %s115_s29 = sshll.u32 %s107_s28, 4  ;;  %p537_p0 = pnand %p290_p13, %p507_p4  ;;  %s116_s29 = int_to_ptr.vmem [resolvable:$true] %s115_s29 }
  0x15   : > { %p269_p1 = scmp.ge.s32.totalorder %s450_s11, 1  ;;  %p120_p2 = scmp.lt.s32.totalorder %s450_s11, 3 }
  0x16   : > { %s104_s2 = scalar_lea.sflag [#allocation5], %s103_s22  ;;  %p344_p3 = pneg %p537_p0 }
  0x17   : > { %s355_s3 = scalar_lea.vmem %s116_s29, 128  ;;  %s452_s4 = smov [#allocation4]  }
  0x18   : > { %p356_p5 = scmp.ne.s32.totalorder %s116_s29, %s355_s3  ;;  %s360_s5 = sshll.u32 %s452_s4, 4  ;;  %s361_s5 = int_to_ptr.vmem [resolvable:$false] %s360_s5 }
  0x19   : > { %s362_s12 = scalar_lea.vmem %s361_s5, 256  ;;  %p363_p10 = scmp.lt.s32.totalorder %s116_s29, %s361_s5 }
  0x1a   : > { %p358_p6 = pnand %p356_p5, %p344_p3  ;;  %p364_p12 = scmp.lt.s32.totalorder %s362_s12, %s355_s3 }
  0x1c   : > { %p359_p7 = pneg %p358_p6  ;;  %p365_p4 = por %p364_p12, %p363_p10 }
  0x1e   : > { %p366_p13 = pnand %p365_p4, %p359_p7 }
  0x20   : > { %369 = shalt.err (!%p366_p13)
}
  0x21   : > { %285 = dma.hbm_to_vmem [thread:$0]  (!%p537_p0), %s113_s27, 128, %s116_s29, %s104_s2  }
  0x22   : > { %p121_p11 = pnand %p269_p1, %p120_p2 }
  0x23   : > { %s552_s13 = sand.u32 (!%p121_p11), 1, %s434_s7  }
  0x24   : > { %124 = sbr.rel (%p121_p11) target bundleno = 79 (0x4f), region = 24  ;;  %s270_s15 = sshll.u32 (!%p121_p11), %s552_s13, 3 }
  0x25   : > { %s127_s16 = scalar_lea.sflag (!%p121_p11), [#allocation5], %s552_s13  ;;  %s130_s17 = scalar_lea.vmem (!%p121_p11), [#allocation4], %s270_s15 }
  0x29   : > { %421 = dma.done.wait (%p513_p8), %s127_s16, 128  }
  0x2a   : > { %423 = vsyncadd (%p513_p8), %s127_s16, 4294967168  ;;  %s148_s22 = scalar_lea.vmem [#allocation7], %s270_s15  ;;  %p272_p12 = scmp.ne.s32.totalorder %s442_s9, 0 }
  0x2c   : > { %152 = sbr.rel (%p272_p12) target bundleno = 51 (0x33), region = 32 }
  0x31   : > { %v453_v0 = vmov 0.0  }
  0x32   : > { %153 = vst [vmem:[#allocation2] sm:$0xff] %v453_v0  ;;  %154 = vst [vmem:[#allocation3] sm:$0xff] %v453_v0 }
  0x33 PF: > { %v155_v5 = vld [vmem:[%s130_s17] sm:$0xff]  ;;  %s275_s23 = sshll.u32 %s442_s9, 7  ;;  %s183_s18 = sshll.u32 %s148_s22, 4  ;;  %v454_v8 = vmov 0.0   ;;  %s567_s18 = int_to_ptr.vmem [resolvable:$true] %s183_s18 }
  0x34   : > { %s565_s26 = scalar_lea.hbm %s614_s1, %s275_s23  ;;  %s169_s27 = scalar_lea.sflag [#allocation6], %s552_s13 }
  0x35   : > { %s370_s9 = scalar_lea.vmem %s567_s18, 128  ;;  %s455_s28 = smov [#allocation7]  }
  0x36   : > { %p371_p8 = scmp.ne.s32.totalorder %s567_s18, %s370_s9  ;;  %s374_s29 = sshll.u32 %s455_s28, 4  ;;  %s375_s29 = int_to_ptr.vmem [resolvable:$false] %s374_s29 }
  0x37   : > { %s376_s30 = scalar_lea.vmem %s375_s29, 256  ;;  %p377_p1 = scmp.lt.s32.totalorder %s567_s18, %s375_s29 }
  0x38   : > { %p372_p11 = pnand %p371_p8, %p517_p9  ;;  %p378_p2 = scmp.lt.s32.totalorder %s376_s30, %s370_s9 }
  0x39   : > { %v156_v1 = vld [vmem:[#allocation2] sm:$0xff]  ;;  %v158_v2 = vld [vmem:[#allocation3] sm:$0xff] }
  0x3a   : > { %v157_v3 = vmul.f32 0.2, %v156_v1  ;;  %v159_v4 = vsub.f32 1.0, %v158_v2  ;;  %p373_p0 = pneg %p372_p11  ;;  %p379_p3 = por %p378_p2, %p377_p1 }
  0x3c   : > { %v160_v6 = vmul.f32 %v159_v4, %v157_v3  ;;  %p380_p5 = pnand %p379_p3, %p373_p0 }
  0x3e   : > { %v161_v7 = vadd.f32 %v160_v6, %v155_v5 }
  0x40   : > { %vm162_vm0 = vcmp.gt.f32.partialorder %v161_v7, 0.5  ;;  %165 = vst [vmem:[#allocation2] sm:$0xff] %v161_v7 }
  0x41   : > { %v273_v9 = vsel %vm162_vm0, 1.0, %v454_v8 }
  0x42   : > { %167 = vst [vmem:[%s148_s22] sm:$0xff] %v273_v9  ;;  %166 = vst [vmem:[#allocation3] sm:$0xff] %v273_v9 }
  0x43   : > { %383 = shalt.err (!%p380_p5)
}
  0x44   : > { %s384_s2 = scalar_lea.hbm %s565_s26, 128  ;;  %s388_s5 = scalar_lea.hbm %s614_s1, 256 }
  0x45   : > { %p385_p6 = scmp.ne.s32.totalorder %s565_s26, %s384_s2  ;;  %p389_p4 = scmp.lt.s32.totalorder %s565_s26, %s614_s1 }
  0x46   : > { %p390_p13 = scmp.lt.s32.totalorder %s388_s5, %s384_s2 }
  0x47   : > { %p386_p7 = pnand %p385_p6, %p517_p9 }
  0x48   : > { %p391_p12 = por %p390_p13, %p389_p4 }
  0x49   : > { %p387_p10 = pneg %p386_p7 }
  0x4b   : > { %p392_p8 = pnand %p391_p12, %p387_p10 }
  0x4d   : > { %395 = shalt.err (!%p392_p8)
}
  0x4e   : > { %280 = dma.vmem_to_hbm [thread:$0]  (%p517_p9), %s567_s18, 128, %s565_s26, %s169_s27  }
  0x4f PF: > { %s195_s15 = sand.u32 1, %s430_s6   ;;  %p620_p11 = scmp.ne.s32.totalorder %s618_s21, 0 }
  0x50   : > { %p621_p0 = scmp.ge.s32.totalorder %s450_s11, 2  ;;  %s196_s16 = scalar_lea.sflag [#allocation6], %s195_s15 }
  0x52   : > { %p287_p1 = pnand %p621_p0, %p620_p11 }
  0x54   : > { %p288_p2 = pneg %p287_p1 }
  0x56   : > { %425 = dma.done.wait (%p288_p2), %s196_s16, 128  }
  0x57   : > { %427 = vsyncadd (%p288_p2), %s196_s16, 4294967168  ;;  %s17_s11 = sadd.s32 1, %s450_s11   ;;  %s622_s6 = smov %s434_s7 }
  0x58   : > { %p14_p3 = scmp.ge.s32.totalorder %s17_s11, 4   ;;  %s623_s7 = smov %s438_s8 }
  0x59   : > { %s624_s8 = smov %s522_s20  ;;  %s625_s9 = smov %s446_s10 }
  0x5a   : > { %s626_s10 = smov %s628_s14  ;;  %16 = sbr.rel (!%p14_p3) target bundleno = 6 (0x6), region = 73 }
  0x5f   :  { %201 = vsyncpa [#allocation5], 1 }
  0x60   :  { %203 = vsyncpa [#allocation5 + $0x1], 1 }
  0x61   :  { %204 = vsyncpa [#allocation6], 1 }
  0x62   :  { %206 = vsyncpa [#allocation6 + $0x1], 1 }

</bundles_post_ra>
